<compile_context>
chip_gen: v7x
topology: tpu7x:2x2x1
jax: 0.10.0
libtpu: 0.0.40
codegen_flags: <defaults>
</compile_context>

<pallas_src>
import jax
import jax.numpy as jnp
from jax.experimental import pallas as pl
from jax.experimental.pallas import tpu as pltpu


def _round_up(x, m):
    return (x + m - 1) // m * m


def _embeddings_kernel(x_ref, wfc_ref, wcls_ref, bcls_ref, logits_ref, emb_ref):
    # x_ref:    (TN, C, H*W)   bfloat16  (streamed batch tile)
    # wfc_ref:  (C, E_pad)     float32   trunk.fc weight (no bias), zero-padded cols
    # wcls_ref: (E_pad, K_pad) float32   classifier weight, zero-padded
    # bcls_ref: (1, K_pad)     float32   classifier bias, zero-padded
    hw = x_ref.shape[-1]

    # trunk feature extraction: global average pool over spatial positions.
    # Upcast to f32 before the reduce; fold the 1/(H*W) scale into one multiply
    # on the small (TN, C) result instead of scaling every element.
    x = x_ref[...].astype(jnp.float32)                              # (TN, C, HW)
    feats = jnp.sum(x, axis=-1) * (1.0 / hw)                        # (TN, C) f32

    # trunk.fc : Linear(C -> E, bias=False)   (MXU, f32 accumulate)
    emb = jnp.dot(feats, wfc_ref[...],
                  preferred_element_type=jnp.float32)               # (TN, E_pad)

    # classifier : Linear(E -> K, bias=True)  (MXU, f32 accumulate)
    logits = jnp.dot(emb, wcls_ref[...],
                     preferred_element_type=jnp.float32) + bcls_ref[...]  # (TN, K_pad)

    emb_ref[...] = emb
    logits_ref[...] = logits


def embeddings_model(x_nchw, w_fc, w_cls, b_cls, *,
                     max_batch_tile=128,
                     x_tile_budget_bytes=24 << 20):
    """Returns (logits, emb) exactly like EmbeddingsModel.forward."""
    N, C, H, W = x_nchw.shape
    HW = H * W
    E = w_fc.shape[1]
    K = w_cls.shape[1]

    # Lane-dense output padding (last dim -> multiple of 128).
    E_pad = _round_up(E, 128)
    K_pad = _round_up(K, 128)

    # --- batch tile sizing: biggest TN (multiple of 8, <= max_batch_tile) such
    # that the two double-buffered bf16 x tiles stay under the budget (keeps
    # v7x's 64 MiB VMEM happy; v5e/v6e get the same or larger tiles). ---
    per_row_bytes = C * HW * 2  # bf16
    tn = max(1, x_tile_budget_bytes // (2 * per_row_bytes))
    tn = min(max_batch_tile, tn)
    tn = max(8, (tn // 8) * 8)
    n8 = _round_up(N, 8)
    TN = n8 if n8 <= tn else tn          # small batches -> single grid step
    N_pad = _round_up(N, TN)
    grid_n = N_pad // TN

    # --- pad / cast inputs in the wrapper ---
    x_flat = x_nchw.reshape(N, C, HW).astype(jnp.bfloat16)
    if N_pad != N:
        x_flat = jnp.pad(x_flat, ((0, N_pad - N), (0, 0), (0, 0)))

    w_fc_p = jnp.zeros((C, E_pad), jnp.float32).at[:, :E].set(
        w_fc.astype(jnp.float32))
    w_cls_p = jnp.zeros((E_pad, K_pad), jnp.float32).at[:E, :K].set(
        w_cls.astype(jnp.float32))
    b_cls_p = jnp.zeros((1, K_pad), jnp.float32).at[0, :K].set(
        b_cls.astype(jnp.float32))

    # Advisory cost estimate: mem-bound on streaming x.
    flops = 2 * N_pad * C * E_pad + 2 * N_pad * E_pad * K_pad + N_pad * C * HW
    bytes_accessed = (x_flat.size * 2
                      + (w_fc_p.size + w_cls_p.size + b_cls_p.size) * 4
                      + N_pad * (E_pad + K_pad) * 4)

    # Explicit scoped-VMEM limit: double-buffered x + double-buffered outputs
    # + resident weights + headroom, clamped to [32 MiB, 64 MiB].
    x_buf_bytes = 2 * TN * per_row_bytes
    out_buf_bytes = 2 * TN * (E_pad + K_pad) * 4
    w_bytes = (w_fc_p.size + w_cls_p.size + b_cls_p.size) * 4
    vmem_limit = min(64 * 1024 * 1024,
                     max(32 * 1024 * 1024,
                         x_buf_bytes + out_buf_bytes + w_bytes + (8 << 20)))

    logits_p, emb_p = pl.pallas_call(
        _embeddings_kernel,
        out_shape=(
            jax.ShapeDtypeStruct((N_pad, K_pad), jnp.float32),   # logits (padded)
            jax.ShapeDtypeStruct((N_pad, E_pad), jnp.float32),   # emb    (padded)
        ),
        grid=(grid_n,),
        in_specs=[
            pl.BlockSpec((TN, C, HW), lambda i: (i, 0, 0)),      # stream x tiles
            pl.BlockSpec((C, E_pad), lambda i: (0, 0)),          # weights resident
            pl.BlockSpec((E_pad, K_pad), lambda i: (0, 0)),
            pl.BlockSpec((1, K_pad), lambda i: (0, 0)),
        ],
        out_specs=(
            pl.BlockSpec((TN, K_pad), lambda i: (i, 0)),
            pl.BlockSpec((TN, E_pad), lambda i: (i, 0)),
        ),
        compiler_params=pltpu.CompilerParams(
            dimension_semantics=("parallel",),                   # megacore-shardable
            vmem_limit_bytes=int(vmem_limit),
        ),
        cost_estimate=pl.CostEstimate(
            flops=int(flops),
            transcendentals=0,
            bytes_accessed=int(bytes_accessed),
        ),
    )(x_flat, w_fc_p, w_cls_p, b_cls_p)

    # Strip batch / lane padding before returning logical outputs.
    return logits_p[:N, :K], emb_p[:N, :E]


if __name__ == "__main__":
    # Small shapes consistent with the module's forward:
    #   input image batch (NCHW), embedding_size, num_classes.
    N, C, H, W = 2, 4, 16, 16
    EMBEDDING_SIZE = 32
    NUM_CLASSES = 10

    key = jax.random.PRNGKey(0)
    kx, kfc, kcls, kb = jax.random.split(key, 4)

    x = jax.random.normal(kx, (N, C, H, W), dtype=jnp.float32)

    # Deterministic parameter init (PyTorch-Linear-like uniform fan-in bounds).
    fc_bound = 1.0 / jnp.sqrt(C)
    w_fc = jax.random.uniform(kfc, (C, EMBEDDING_SIZE),
                              minval=-fc_bound, maxval=fc_bound,
                              dtype=jnp.float32)
    cls_bound = 1.0 / jnp.sqrt(EMBEDDING_SIZE)
    w_cls = jax.random.uniform(kcls, (EMBEDDING_SIZE, NUM_CLASSES),
                               minval=-cls_bound, maxval=cls_bound,
                               dtype=jnp.float32)
    b_cls = jax.random.uniform(kb, (NUM_CLASSES,),
                               minval=-cls_bound, maxval=cls_bound,
                               dtype=jnp.float32)

    logits, emb = embeddings_model(x, w_fc, w_cls, b_cls)
    jax.block_until_ready((logits, emb))

    # Pure-JAX reference mirroring the kernel semantics (x streamed in bf16,
    # pooling + matmuls accumulated in f32).
    x_stream = x.reshape(N, C, H * W).astype(jnp.bfloat16).astype(jnp.float32)
    feats_ref = jnp.sum(x_stream, axis=-1) * (1.0 / (H * W))
    emb_ref = feats_ref @ w_fc
    logits_ref = emb_ref @ w_cls + b_cls

    assert emb.shape == (N, EMBEDDING_SIZE) and logits.shape == (N, NUM_CLASSES)
    assert jnp.allclose(emb, emb_ref, atol=1e-4, rtol=1e-4)
    assert jnp.allclose(logits, logits_ref, atol=1e-4, rtol=1e-4)

    print("KERNEL_OK")
</pallas_src>

<mosaic_0001>
module attributes {stable_mosaic.version = 11 : i64} {
  func.func @_embeddings_kernel(%arg0: i32, %arg1: memref<8x4x256xbf16, #tpu.memory_space<vmem>>, %arg2: memref<4x128xf32, #tpu.memory_space<vmem>>, %arg3: memref<128x128xf32, #tpu.memory_space<vmem>>, %arg4: memref<1x128xf32, #tpu.memory_space<vmem>>, %arg5: memref<8x128xf32, #tpu.memory_space<vmem>>, %arg6: memref<8x128xf32, #tpu.memory_space<vmem>>) attributes {dimension_semantics = [#tpu.dimension_semantics<parallel>], iteration_bounds = array<i64: 1>, scalar_prefetch = 0 : i64, scratch_operands = 0 : i64, tpu.core_type = #tpu.core_type<tc>, window_params = [{transform_indices = @transform_0, window_bounds = array<i64: 8, 4, 256>}, {pipeline_mode = #tpu.pipeline_mode<synchronous>, transform_indices = @transform_1, window_bounds = array<i64: 4, 128>}, {pipeline_mode = #tpu.pipeline_mode<synchronous>, transform_indices = @transform_2, window_bounds = array<i64: 128, 128>}, {pipeline_mode = #tpu.pipeline_mode<synchronous>, transform_indices = @transform_3, window_bounds = array<i64: 1, 128>}, {transform_indices = @transform_4, window_bounds = array<i64: 8, 128>}, {transform_indices = @transform_5, window_bounds = array<i64: 8, 128>}]} {
    %c0 = arith.constant 0 : index
    %c0_0 = arith.constant 0 : index
    %c0_1 = arith.constant 0 : index
    %0 = vector.load %arg1[%c0, %c0_0, %c0_1] : memref<8x4x256xbf16, #tpu.memory_space<vmem>>, vector<8x4x256xbf16>
    %1 = arith.extf %0 : vector<8x4x256xbf16> to vector<8x4x256xf32>
    %cst = arith.constant dense<0.000000e+00> : vector<8x4xf32>
    %2 = vector.multi_reduction <add>, %1, %cst [2] : vector<8x4x256xf32> to vector<8x4xf32>
    %cst_2 = arith.constant 3.906250e-03 : f32
    %3 = vector.broadcast %cst_2 : f32 to vector<8x4xf32>
    %4 = arith.mulf %2, %3 : vector<8x4xf32>
    %c0_3 = arith.constant 0 : index
    %c0_4 = arith.constant 0 : index
    %5 = vector.load %arg2[%c0_3, %c0_4] : memref<4x128xf32, #tpu.memory_space<vmem>>, vector<4x128xf32>
    %cst_5 = arith.constant dense<0.000000e+00> : vector<8x128xf32>
    %6 = tpu.matmul %4, %5, %cst_5 {dimension_numbers = #tpu.dot_dimension_numbers<[1], [0], [0], [1], [0, 0, 1, 1], [], []>} : vector<8x4xf32>, vector<4x128xf32>, vector<8x128xf32> -> vector<8x128xf32>
    %c0_6 = arith.constant 0 : index
    %c0_7 = arith.constant 0 : index
    %7 = vector.load %arg3[%c0_6, %c0_7] : memref<128x128xf32, #tpu.memory_space<vmem>>, vector<128x128xf32>
    %cst_8 = arith.constant dense<0.000000e+00> : vector<8x128xf32>
    %8 = tpu.matmul %6, %7, %cst_8 {dimension_numbers = #tpu.dot_dimension_numbers<[1], [0], [0], [1], [0, 0, 1, 1], [], []>} : vector<8x128xf32>, vector<128x128xf32>, vector<8x128xf32> -> vector<8x128xf32>
    %c0_9 = arith.constant 0 : index
    %c0_10 = arith.constant 0 : index
    %9 = vector.load %arg4[%c0_9, %c0_10] : memref<1x128xf32, #tpu.memory_space<vmem>>, vector<1x128xf32>
    %10 = vector.broadcast %9 : vector<1x128xf32> to vector<8x128xf32>
    %11 = arith.addf %8, %10 : vector<8x128xf32>
    %c0_11 = arith.constant 0 : index
    %c0_12 = arith.constant 0 : index
    %12 = vector.load %arg6[%c0_11, %c0_12] : memref<8x128xf32, #tpu.memory_space<vmem>>, vector<8x128xf32>
    tpu.vector_store %arg6[%c0_11, %c0_12], %6 {strides = array<i32>} : memref<8x128xf32, #tpu.memory_space<vmem>>, vector<8x128xf32>,
    %c0_13 = arith.constant 0 : index
    %c0_14 = arith.constant 0 : index
    %13 = vector.load %arg5[%c0_13, %c0_14] : memref<8x128xf32, #tpu.memory_space<vmem>>, vector<8x128xf32>
    tpu.vector_store %arg5[%c0_13, %c0_14], %11 {strides = array<i32>} : memref<8x128xf32, #tpu.memory_space<vmem>>, vector<8x128xf32>,
    return
  }
  func.func @transform_0(%arg0: i32) -> (i32, i32, i32) {
    %c0_i32 = arith.constant 0 : i32
    %c0_i32_0 = arith.constant 0 : i32
    %c0_i32_1 = arith.constant 0 : i32
    return %arg0, %c0_i32, %c0_i32_0 : i32, i32, i32
  }
  func.func @transform_1(%arg0: i32) -> (i32, i32) {
    %c0_i32 = arith.constant 0 : i32
    %c0_i32_0 = arith.constant 0 : i32
    %c0_i32_1 = arith.constant 0 : i32
    return %c0_i32, %c0_i32_0 : i32, i32
  }
  func.func @transform_2(%arg0: i32) -> (i32, i32) {
    %c0_i32 = arith.constant 0 : i32
    %c0_i32_0 = arith.constant 0 : i32
    %c0_i32_1 = arith.constant 0 : i32
    return %c0_i32, %c0_i32_0 : i32, i32
  }
  func.func @transform_3(%arg0: i32) -> (i32, i32) {
    %c0_i32 = arith.constant 0 : i32
    %c0_i32_0 = arith.constant 0 : i32
    %c0_i32_1 = arith.constant 0 : i32
    return %c0_i32, %c0_i32_0 : i32, i32
  }
  func.func @transform_4(%arg0: i32) -> (i32, i32) {
    %c0_i32 = arith.constant 0 : i32
    %c0_i32_0 = arith.constant 0 : i32
    return %arg0, %c0_i32 : i32, i32
  }
  func.func @transform_5(%arg0: i32) -> (i32, i32) {
    %c0_i32 = arith.constant 0 : i32
    %c0_i32_0 = arith.constant 0 : i32
    return %arg0, %c0_i32 : i32, i32
  }
}

</mosaic_0001>

<bundles_post_ra>
// kernel: tpu_custom_call.1
= control target key start
LH: loop header
LB: loop body
LE: loop exit
PB: predicated region body
PF: predicated region fallthrough
CT: control target
= control target key end

     0   :  { %11 = vsyncpa [#allocation3], 0  ;;  %s771_s0 = inlined_call_operand.hbm [shape: bf16[8,4,256], index: 0, kind: input, shape index: {}]   ;;  %s772_s1 = inlined_call_operand.hbm [shape: f32[4,128], index: 1, kind: input, shape index: {}]   ;;  %s773_s2 = inlined_call_operand.hbm [shape: f32[128,128], index: 2, kind: input, shape index: {}]   ;;  %s774_s3 = inlined_call_operand.vmem [shape: f32[1,128], index: 3, kind: input, shape index: {}]   ;;  %s775_s4 = inlined_call_operand.hbm [shape: f32[8,128], index: 4, kind: output, shape index: {0}]   ;;  %s776_s5 = inlined_call_operand.hbm [shape: f32[8,128], index: 5, kind: output, shape index: {1}]  }
   0x1   :  { %12 = vsyncpa [#allocation6], 0 }
   0x2   :  { %13 = vsyncpa [#allocation4], 0 }
   0x3   :  { %14 = vsyncpa [#allocation10], 0  ;;  %s642_s18 = smov [#allocation5]   ;;  %s643_s20 = smov [#allocation2]  }
   0x4   :  { %s33_s19 = sshll.u32 %s642_s18, 4  ;;  %s20_s21 = sshll.u32 %s643_s20, 4  ;;  %s34_s19 = int_to_ptr.vmem [resolvable:$true] %s33_s19  ;;  %s684_s21 = int_to_ptr.vmem [resolvable:$true] %s20_s21 }
   0x5   :  { %s524_s24 = scalar_lea.hbm %s772_s1, 64 }
   0x6   :  { %p525_p0 = scmp.ne.s32.totalorder %s772_s1, %s524_s24  ;;  %p528_p1 = scmp.lt.u32.totalorder %s524_s24, %s772_s1 }
   0x8   :  { %p530_p2 = pnand %p528_p1, %p525_p0 }
   0xa   :  { %533 = shalt.err (!%p530_p2)
}
   0xb   :  { %s534_s29 = scalar_lea.vmem %s34_s19, 64  ;;  %p539_p4 = scmp.lt.s32.totalorder %s34_s19, %s34_s19 }
   0xc   :  { %p535_p3 = scmp.ne.s32.totalorder %s34_s19, %s534_s29  ;;  %p540_p5 = scmp.lt.s32.totalorder %s534_s29, %s534_s29 }
   0xe   :  { %p541_p6 = por %p540_p5, %p539_p4 }
  0x10   :  { %p542_p7 = pnand %p541_p6, %p535_p3 }
  0x12   :  { %545 = shalt.err (!%p542_p7)
}
  0x13   :  { %36 = dma.hbm_to_vmem [thread:$0]  %s772_s1, 64, %s34_s19, [#allocation6]  }
  0x14   :  { %s546_s9 = scalar_lea.hbm %s771_s0, 512 }
  0x15   :  { %p547_p8 = scmp.ne.s32.totalorder %s771_s0, %s546_s9  ;;  %p550_p9 = scmp.lt.u32.totalorder %s546_s9, %s771_s0 }
  0x17   :  { %p552_p10 = pnand %p550_p9, %p547_p8 }
  0x19   :  { %555 = shalt.err (!%p552_p10)
}
  0x1a   :  { %s556_s14 = scalar_lea.vmem %s684_s21, 512  ;;  %p561_p12 = scmp.lt.s32.totalorder %s684_s21, %s684_s21 }
  0x1b   :  { %p557_p11 = scmp.ne.s32.totalorder %s684_s21, %s556_s14  ;;  %p562_p13 = scmp.lt.s32.totalorder %s556_s14, %s556_s14 }
  0x1d   :  { %p563_p0 = por %p562_p13, %p561_p12 }
  0x1f   :  { %p564_p1 = pnand %p563_p0, %p557_p11 }
  0x21   :  { %567 = shalt.err (!%p564_p1)
}
  0x22   :  { %s644_s1 = smov 64   ;;  %s645_s15 = smov 4  }
  0x23   :  { %26 = dma.hbm_to_vmem [thread:$0]  %s771_s0, 512, %s684_s21, [#allocation3], %s644_s1, %s644_s1, %s645_s15  }
  0x24   :  { %s646_s18 = smov [#allocation7]   ;;  %s568_s23 = scalar_lea.hbm %s773_s2, 2048 }
  0x25   :  { %s42_s19 = sshll.u32 %s646_s18, 4  ;;  %p569_p2 = scmp.ne.s32.totalorder %s773_s2, %s568_s23  ;;  %s43_s19 = int_to_ptr.vmem [resolvable:$true] %s42_s19 }
  0x26   :  { %p572_p3 = scmp.lt.u32.totalorder %s568_s23, %s773_s2 }
  0x28   :  { %p574_p4 = pnand %p572_p3, %p569_p2 }
  0x2a   :  { %577 = shalt.err (!%p574_p4)
}
  0x2b   :  { %s578_s28 = scalar_lea.vmem %s43_s19, 2048  ;;  %p583_p6 = scmp.lt.s32.totalorder %s43_s19, %s43_s19 }
  0x2c   :  { %p579_p5 = scmp.ne.s32.totalorder %s43_s19, %s578_s28  ;;  %p584_p7 = scmp.lt.s32.totalorder %s578_s28, %s578_s28 }
  0x2e   :  { %p585_p8 = por %p584_p7, %p583_p6 }
  0x30   :  { %p586_p9 = pnand %p585_p8, %p579_p5 }
  0x32   :  { %589 = shalt.err (!%p586_p9)
}
  0x33   :  { %s647_s0 = smov 128   ;;  %s648_s21 = smov 8  }
  0x34   :  { %48 = dma.hbm_to_vmem [thread:$0]  %s773_s2, 2048, %s43_s19, [#allocation6], %s647_s0, %s647_s0, %s648_s21  }
  0x35   :  { %634 = dma.done.wait [#allocation3], 512  }
  0x36   :  { %635 = vsyncadd [#allocation3], 4294966784 }
  0x37   :  { %636 = dma.done.wait [#allocation6], 2112  }
  0x38   :  { %637 = vsyncadd [#allocation6], 4294965184  ;;  %v411_v0 = vld [vmem:[#allocation2] sm:$0xff]   ;;  %vm100_vm0 = vcmask 1043456   ;;  %v426_v1 = vld [vmem:[#allocation2 + $0x8] sm:$0xff]   ;;  %v649_v45 = vmov 0.0  }
  0x39   :  { %v427_v2 = vld [vmem:[#allocation2 + $0x10] sm:$0xff]   ;;  %v412_v3 = vunpack.c.l.bf16 %v411_v0  ;;  %v416_v4 = vunpack.c.l.bf16 %v426_v1  ;;  %v413_v5 = vunpack.c.h.bf16 %v411_v0  ;;  %v417_v6 = vunpack.c.h.bf16 %v426_v1  ;;  %v428_v7 = vld [vmem:[#allocation2 + $0x18] sm:$0xff]   ;;  %v149_v44 = vld [vmem:[#allocation5] sm:$0xf]  ;;  %448 = vmatprep.subr.mxu0 %v649_v45  ;;  %s652_s2 = smov [#allocation9]  }
  0x3a   :  { %v420_v8 = vunpack.c.l.bf16 %v427_v2  ;;  %v421_v9 = vunpack.c.h.bf16 %v427_v2  ;;  %v424_v10 = vunpack.c.l.bf16 %v428_v7  ;;  %v425_v18 = vunpack.c.h.bf16 %v428_v7  ;;  %449 = vmatpush3.msk.msra.mxu0 %vm100_vm0, %v149_v44  ;;  %v282_v46 = vld [vmem:[#allocation7] sm:$0xff]  ;;  %v283_v47 = vld [vmem:[#allocation7 + $0x8] sm:$0xff]  ;;  %v284_v48 = vld [vmem:[#allocation7 + $0x10] sm:$0xff]  ;;  %s393_s6 = sshll.u32 %s652_s2, 4  ;;  %s394_s6 = int_to_ptr.vmem [resolvable:$true] %s393_s6 }
  0x3b   :  { %v84_v11 = vcombine.high %v412_v3, %v412_v3  ;;  %v101_v12 = vsel %vm100_vm0, %v412_v3, 0.0  ;;  %v86_v13 = vcombine.high %v416_v4, %v416_v4  ;;  %v111_v14 = vsel %vm100_vm0, %v416_v4, 0.0  ;;  %v285_v51 = vld [vmem:[#allocation7 + $0x18] sm:$0xff]  ;;  %v286_v53 = vld [vmem:[#allocation7 + $0x20] sm:$0xff]  ;;  %v287_v54 = vld [vmem:[#allocation7 + $0x28] sm:$0xff]  ;;  %s590_s7 = scalar_lea.vmem %s394_s6, 128  ;;  %p595_p11 = scmp.lt.s32.totalorder %s394_s6, %s394_s6 }
  0x3c   :  { %v85_v15 = vcombine.high %v413_v5, %v413_v5  ;;  %v106_v16 = vsel %vm100_vm0, %v413_v5, 0.0  ;;  %v87_v17 = vcombine.high %v417_v6, %v417_v6  ;;  %v116_v21 = vsel %vm100_vm0, %v417_v6, 0.0  ;;  %v288_v56 = vld [vmem:[#allocation7 + $0x30] sm:$0xff]  ;;  %v289_v57 = vld [vmem:[#allocation7 + $0x38] sm:$0xff]  ;;  %v290_v59 = vld [vmem:[#allocation7 + $0x40] sm:$0xff]  ;;  %p591_p10 = scmp.ne.s32.totalorder %s394_s6, %s590_s7  ;;  %p596_p12 = scmp.lt.s32.totalorder %s590_s7, %s590_s7 }
  0x3d   :  { %v102_v19 = vsel %vm100_vm0, %v84_v11, 0.0  ;;  %v112_v20 = vsel %vm100_vm0, %v86_v13, 0.0  ;;  %v88_v22 = vcombine.high %v420_v8, %v420_v8  ;;  %v89_v27 = vcombine.high %v421_v9, %v421_v9  ;;  %v291_v60 = vld [vmem:[#allocation7 + $0x48] sm:$0xff]  ;;  %v292_v62 = vld [vmem:[#allocation7 + $0x50] sm:$0xff]  ;;  %v293_v63 = vld [vmem:[#allocation7 + $0x58] sm:$0xff] }
  0x3e   :  { %v103_v23 = vadd.f32 %v102_v19, %v101_v12  ;;  %v113_v24 = vadd.f32 %v112_v20, %v111_v14  ;;  %v107_v25 = vsel %vm100_vm0, %v85_v15, 0.0  ;;  %v117_v26 = vsel %vm100_vm0, %v87_v17, 0.0  ;;  %v294_v1 = vld [vmem:[#allocation7 + $0x60] sm:$0xff]  ;;  %v295_v2 = vld [vmem:[#allocation7 + $0x68] sm:$0xff]  ;;  %v296_v4 = vld [vmem:[#allocation7 + $0x70] sm:$0xff]  ;;  %p597_p13 = por %p596_p12, %p595_p11 }
  0x3f   :  { %v108_v28 = vadd.f32 %v107_v25, %v106_v16  ;;  %v118_v29 = vadd.f32 %v117_v26, %v116_v21  ;;  %v121_v30 = vsel %vm100_vm0, %v420_v8, 0.0  ;;  %v122_v31 = vsel %vm100_vm0, %v88_v22, 0.0  ;;  %v297_v5 = vld [vmem:[#allocation7 + $0x78] sm:$0xff] }
  0x40   :  { %104 = vadd.xlane.f32.xlu0 %v103_v23  ;;  %114 = vadd.xlane.f32.xlu1 %v113_v24  ;;  %v126_v32 = vsel %vm100_vm0, %v421_v9, 0.0  ;;  %v127_v33 = vsel %vm100_vm0, %v89_v27, 0.0  ;;  %v90_v34 = vcombine.high %v424_v10, %v424_v10  ;;  %v91_v35 = vcombine.high %v425_v18, %v425_v18  ;;  %p598_p0 = pnand %p597_p13, %p591_p10 }
  0x41   :  { %v123_v36 = vadd.f32 %v122_v31, %v121_v30  ;;  %v128_v37 = vadd.f32 %v127_v33, %v126_v32  ;;  %v131_v38 = vsel %vm100_vm0, %v424_v10, 0.0  ;;  %v136_v40 = vsel %vm100_vm0, %v425_v18, 0.0 }
  0x42   :  { %v132_v39 = vsel %vm100_vm0, %v90_v34, 0.0  ;;  %v137_v41 = vsel %vm100_vm0, %v91_v35, 0.0  ;;  %vm650_vm1 = vmmov 0   ;;  %v651_v49 = vmov 0.0|0.0  }
  0x43   :  { %v133_v42 = vadd.f32 %v132_v39, %v131_v38  ;;  %v138_v43 = vadd.f32 %v137_v41, %v136_v40  ;;  %450 = vmatprep.mubr.msk.f32.mxu0 %vm650_vm1, %v649_v45  ;;  %485 = vmatprep.mubr.msk.f32.mxu1 %vm650_vm1, %v649_v45  ;;  %v489_v50 = vpack.c.bf16 %v283_v47, %v282_v46  ;;  %v158_v7 = vlaneseq }
  0x44   :  { %109 = vadd.xlane.f32.xlu0 %v108_v28  ;;  %119 = vadd.xlane.f32.xlu1 %v118_v29  ;;  %v492_v52 = vpack.c.bf16 %v285_v51, %v284_v48  ;;  %v495_v55 = vpack.c.bf16 %v287_v54, %v286_v53  ;;  %v498_v58 = vpack.c.bf16 %v289_v57, %v288_v56  ;;  %vm192_vm2 = vcmask 1041409  }
  0x45   :  { %488 = vmatprep.subr.bf16.mxu1 %v651_v49  ;;  %v501_v61 = vpack.c.bf16 %v291_v60, %v290_v59  ;;  %v504_v0 = vpack.c.bf16 %v293_v63, %v292_v62  ;;  %v507_v3 = vpack.c.bf16 %v295_v2, %v294_v1  ;;  %v510_v6 = vpack.c.bf16 %v297_v5, %v296_v4 }
  0x46   :  { %490 = vmatpush3.bf16.msra.mxu1 %v489_v50  ;;  %v159_v8 = vand.u32 127, %v158_v7  ;;  %v161_v9 = vshrl.u32 %v158_v7, 7  ;;  %vm194_vm3 = vcmask 1042434   ;;  %vm196_vm4 = vcmask 1043459  }
  0x47   :  { %491 = vmatprep.subr.bf16.mxu1 %v651_v49  ;;  %vm198_vm5 = vcmask 1044484   ;;  %vm200_vm6 = vcmask 1045509   ;;  %vm202_vm7 = vcmask 1046534   ;;  %vm204_vm8 = vcmask 1047559  }
  0x48   :  { %124 = vadd.xlane.f32.xlu0 %v123_v36  ;;  %129 = vadd.xlane.f32.xlu1 %v128_v37  ;;  %v162_v12 = vsub.s32 %v159_v8, %v161_v9  ;;  %vm206_vm9 = vcmask 31744  }
  0x4a   :  { %493 = vmatpush3.bf16.msra.mxu1 %v492_v52 }
  0x4b   :  { %494 = vmatprep.subr.bf16.mxu1 %v651_v49 }
  0x4c   :  { %134 = vadd.xlane.f32.xlu0 %v133_v42  ;;  %139 = vadd.xlane.f32.xlu1 %v138_v43 }
  0x4e   :  { %496 = vmatpush3.bf16.msra.mxu1 %v495_v55 }
  0x4f   :  { %497 = vmatprep.subr.bf16.mxu1 %v651_v49 }
  0x52   :  { %499 = vmatpush3.bf16.msra.mxu1 %v498_v58 }
  0x53   :  { %500 = vmatprep.subr.bf16.mxu1 %v651_v49 }
  0x56   :  { %502 = vmatpush3.bf16.msra.mxu1 %v501_v61 }
  0x57   :  { %503 = vmatprep.subr.bf16.mxu1 %v651_v49 }
  0x5a   :  { %505 = vmatpush3.bf16.msra.mxu1 %v504_v0 }
  0x5b   :  { %506 = vmatprep.subr.bf16.mxu1 %v651_v49 }
  0x5e   :  { %508 = vmatpush3.bf16.msra.mxu1 %v507_v3 }
  0x5f   :  { %509 = vmatprep.subr.bf16.mxu1 %v651_v49 }
  0x62   :  { %511 = vmatpush3.bf16.msra.mxu1 %v510_v6 }
  0xcd   :  { %v105_v10 = vpop.xlane.xlu0 %104  ;;  %v115_v11 = vpop.xlane.xlu1 %114 }
  0xce   :  { %v141_v13 = vmul.f32 0.00390625, %v105_v10  ;;  %v143_v14 = vmul.f32 0.00390625, %v115_v11 }
  0xd0   :  { %v163_v19 = vrot.slane %v141_v13, %v162_v12  ;;  %v171_v22 = vrot.slane %v143_v14, %v162_v12 }
  0xd1   :  { %v110_v15 = vpop.xlane.xlu0 %109  ;;  %v120_v16 = vpop.xlane.xlu1 %119 }
  0xd2   :  { %v142_v17 = vmul.f32 0.00390625, %v110_v15  ;;  %v144_v18 = vmul.f32 0.00390625, %v120_v16 }
  0xd4   :  { %v167_v20 = vrot.slane %v142_v17, %v162_v12  ;;  %v175_v21 = vrot.slane %v144_v18, %v162_v12 }
  0xd5   :  { %v125_v23 = vpop.xlane.xlu0 %124  ;;  %v130_v24 = vpop.xlane.xlu1 %129 }
  0xd6   :  { %v193_v25 = vsel %vm192_vm2, %v167_v20, %v163_v19  ;;  %v145_v26 = vmul.f32 0.00390625, %v125_v23  ;;  %v146_v27 = vmul.f32 0.00390625, %v130_v24 }
  0xd7   :  { %v195_v28 = vsel %vm194_vm3, %v171_v22, %v193_v25 }
  0xd8   :  { %v197_v29 = vsel %vm196_vm4, %v175_v21, %v195_v28  ;;  %v179_v30 = vrot.slane %v145_v26, %v162_v12  ;;  %v183_v31 = vrot.slane %v146_v27, %v162_v12 }
  0xd9   :  { %v135_v32 = vpop.xlane.xlu0 %134  ;;  %v140_v33 = vpop.xlane.xlu1 %139 }
  0xda   :  { %v199_v34 = vsel %vm198_vm5, %v179_v30, %v197_v29  ;;  %v147_v35 = vmul.f32 0.00390625, %v135_v32  ;;  %v148_v36 = vmul.f32 0.00390625, %v140_v33 }
  0xdb   :  { %v201_v39 = vsel %vm200_vm6, %v183_v31, %v199_v34 }
  0xdc   :  { %v187_v37 = vrot.slane %v147_v35, %v162_v12  ;;  %v191_v38 = vrot.slane %v148_v36, %v162_v12 }
  0xde   :  { %v203_v40 = vsel %vm202_vm7, %v187_v37, %v201_v39 }
  0xdf   :  { %v205_v41 = vsel %vm204_vm8, %v191_v38, %v203_v40 }
  0xe0   :  { %451 = vmatmul.mubr.msk.f32.vlgmr.msra.gmra.mrb[0].mxu0 %vm206_vm9, %v205_v41 }
 0x1b3   :  { %v278_v42 = vpop.f32.mrb[0].mxu0 }
 0x1b4   :  { %375 = vst [vmem:[#allocation9] sm:$0xff] %v278_v42  ;;  %v452_v43 = vpop.f32.mrb[1].mxu0  ;;  %486 = vmatmul.mubr.f32.vlgmr.msra.gmra.mrb[0].mxu1 %v278_v42 }
 0x1b5   :  { %601 = shalt.err (!%p598_p0)
}
 0x1b6   :  { %s602_s10 = scalar_lea.hbm %s776_s5, 128 }
 0x1b7   :  { %p603_p1 = scmp.ne.s32.totalorder %s776_s5, %s602_s10  ;;  %p606_p2 = scmp.lt.u32.totalorder %s602_s10, %s776_s5 }
 0x1b9   :  { %p608_p3 = pnand %p606_p2, %p603_p1 }
 0x1bb   :  { %611 = shalt.err (!%p608_p3)
}
 0x1bc   :  { %396 = dma.vmem_to_hbm [thread:$0]  %s394_s6, 128, %s776_s5, [#allocation10]   ;;  %v409_v44 = vld [vmem:[%s774_s3] ss:$0 sm:$0xff] }
 0x1bd   :  { %s653_s18 = smov [#allocation8]  }
 0x1be   :  { %s383_s19 = sshll.u32 %s653_s18, 4  ;;  %s384_s19 = int_to_ptr.vmem [resolvable:$true] %s383_s19 }
 0x1bf   :  { %s612_s20 = scalar_lea.vmem %s384_s19, 128  ;;  %p617_p5 = scmp.lt.s32.totalorder %s384_s19, %s384_s19 }
 0x1c0   :  { %p613_p4 = scmp.ne.s32.totalorder %s384_s19, %s612_s20  ;;  %p618_p6 = scmp.lt.s32.totalorder %s612_s20, %s612_s20 }
 0x1c2   :  { %p619_p7 = por %p618_p6, %p617_p5 }
 0x1c4   :  { %p620_p8 = pnand %p619_p7, %p613_p4 }
 0x287   :  { %v371_v45 = vpop.f32.mrb[0].mxu1 }
 0x288   :  { %v372_v46 = vadd.f32 %v409_v44, %v371_v45  ;;  %v487_v47 = vpop.f32.mrb[1].mxu1 }
 0x28a   :  { %376 = vst [vmem:[#allocation8] sm:$0xff] %v372_v46 }
 0x28b   :  { %623 = shalt.err (!%p620_p8)
}
 0x28c   :  { %s624_s23 = scalar_lea.hbm %s775_s4, 128 }
 0x28d   :  { %p625_p9 = scmp.ne.s32.totalorder %s775_s4, %s624_s23  ;;  %p628_p10 = scmp.lt.u32.totalorder %s624_s23, %s775_s4 }
 0x28f   :  { %p630_p11 = pnand %p628_p10, %p625_p9 }
 0x291   :  { %633 = shalt.err (!%p630_p11)
}
 0x292   :  { %386 = dma.vmem_to_hbm [thread:$0]  %s384_s19, 128, %s775_s4, [#allocation4]  }
 0x293   :  { %638 = dma.done.wait [#allocation4], 128  }
 0x294   :  { %639 = vsyncadd [#allocation4], 4294967168 }
 0x295   :  { %640 = dma.done.wait [#allocation10], 128  }
 0x296   :  { %641 = vsyncadd [#allocation10], 4294967168 }
 0x297   :  { %403 = vsyncpa [#allocation3], 1 }
 0x298   :  { %404 = vsyncpa [#allocation6], 1 }
 0x299   :  { %405 = vsyncpa [#allocation4], 1 }
 0x29a   :  { %406 = vsyncpa [#allocation10], 1 }

</bundles_post_ra>
